<compile_context>
chip_gen: v7x
topology: tpu7x:2x2x1
jax: 0.10.0
libtpu: 0.0.40
codegen_flags: <defaults>
</compile_context>

<pallas_src>
import functools

import jax
import jax.numpy as jnp
from jax.experimental import pallas as pl
from jax.experimental.pallas import tpu as pltpu

# ----------------------------- configuration --------------------------------
LEAKY_SLOPE = 0.2
BN_EPS = 1e-5
NODE_DIM = 32      # args.node_dim
EDGE_DIM = 32      # args.edge_dim
NB_NODES_ARG = 2   # args.nb_nodes
NB_NODES = NB_NODES_ARG * 2   # self.nb_nodes in the module
DROPOUT_P = 0.0    # args.dropout (0.0 => dropout is identity)

# cell_arch entries: (src, dst, w, ops)  -> link_dict[dst] = [(src, w), ...]
CELL_ARCH = [
    (0, 1, 0, "ops"),
    (0, 2, 1, "ops"), (1, 2, 2, "ops"),
    (1, 3, 3, "ops"), (2, 3, 4, "ops"),
    (0, 4, 5, "ops"), (3, 4, 6, "ops"),
]
NUM_OPS = 3  # candidate ops inside the mixed op (see mixed_op below)


def build_link_dict(cell_arch):
    link_dict = {}
    for src, dst, w, _ops in cell_arch:
        link_dict.setdefault(dst, []).append((src, w))
    return link_dict


LINK_DICT = build_link_dict(CELL_ARCH)
# Static, hashable view for the kernel closure: LINKS[d-1] = ((src, w), ...)
LINKS = tuple(tuple(LINK_DICT[d]) for d in range(1, NB_NODES + 1))

# Rows inside the packed (8,128) parameter slab.
_ROW_BV, _ROW_GV, _ROW_BETAV, _ROW_BS, _ROW_GE, _ROW_BETAE = range(6)


# ------------------------------ Pallas kernel --------------------------------
def _cell_kernel(wt_ref, a_ref, g_ref, v_ref, e_ref, wv_ref, ws_ref, pp_ref,
                 vout_ref, eout_ref, *, links, node_dim, edge_dim, slope, eps):
    """One Cell forward per grid step (grid axis = batch of independent cells).

    wt:[A,3] (SMEM)  a:[N,N]  g:[2M,N] (stacked one-hot src/dst)
    v:[N,D]  e:[M,De]  wv:[nb*D,D]  ws:[2D+De,De]  pp:[8,128] packed params
    outs: vout:[N,D]  eout:[M,De]
    """
    d, de = node_dim, edge_dim
    m = e_ref.shape[0]

    v_in = v_ref[...]
    e_in = e_ref[...]
    a_mean = a_ref[...]

    # ---- NAS state loop, statically unrolled. Mean-aggregation is a dense
    # (N,N) @ (N,D) MXU matmul, memoized per source state (states[0] is used
    # by 3 links, states[1] by 2 with this CELL_ARCH -> 4 matmuls, not 7).
    # TODO(synk): the original `Mixed` module (models/mixed.py) is external and
    # not given in the reference; this implements the stand-in op set
    # {zero, identity, mean-neighbour-aggregation} mixed by weight[w].
    states = [v_in]
    aggs = {}

    def agg_of(s):
        if s not in aggs:
            aggs[s] = jnp.dot(a_mean, states[s],
                              preferred_element_type=jnp.float32)
        return aggs[s]

    for dst_links in links:
        acc = None
        for s, w in dst_links:
            term = wt_ref[w, 1] * states[s] + wt_ref[w, 2] * agg_of(s)
            acc = term if acc is None else acc + term
        states.append(acc)

    # ---- trans_concat_V without the lane concat: static sum of block matmuls
    # against sublane-aligned row slices of Wv.
    bv = pp_ref[_ROW_BV:_ROW_BV + 1, :d]
    v_lin = bv
    for k, st in enumerate(states[1:]):
        v_lin = v_lin + jnp.dot(st, wv_ref[k * d:(k + 1) * d, :],
                                preferred_element_type=jnp.float32)

    # ---- apply_edges: both endpoint gathers as ONE (2M,N)@(N,D) one-hot MXU
    # matmul (no XLA gather, no v_lin HBM round-trip), then the S linear as
    # three block matmuls against row slices of Ws (no lane concat).
    vg = jnp.dot(g_ref[...], v_lin, preferred_element_type=jnp.float32)
    v_src = vg[:m, :]
    v_dst = vg[m:, :]
    e_act = jnp.where(e_in >= 0, e_in, slope * e_in)

    bs = pp_ref[_ROW_BS:_ROW_BS + 1, :de]
    e_lin = (jnp.dot(v_src, ws_ref[0:d, :], preferred_element_type=jnp.float32)
             + jnp.dot(e_act, ws_ref[d:d + de, :],
                       preferred_element_type=jnp.float32)
             + jnp.dot(v_dst, ws_ref[d + de:2 * d + de, :],
                       preferred_element_type=jnp.float32)
             + bs)

    # ---- fused BatchNorm1d (batch stats) -> LeakyReLU -> residual.
    # Two-pass mean / centered variance for robustness; rsqrt on the EUP.
    def bn_leaky_res(h, g, b, res):
        inv_n = 1.0 / h.shape[0]
        mean = jnp.sum(h, axis=0, keepdims=True) * inv_n
        diff = h - mean
        var = jnp.sum(diff * diff, axis=0, keepdims=True) * inv_n  # biased (PyTorch BN fwd)
        hn = diff * jax.lax.rsqrt(var + eps) * g + b
        return jnp.where(hn >= 0, hn, slope * hn) + res

    gv = pp_ref[_ROW_GV:_ROW_GV + 1, :d]
    betav = pp_ref[_ROW_BETAV:_ROW_BETAV + 1, :d]
    ge = pp_ref[_ROW_GE:_ROW_GE + 1, :de]
    betae = pp_ref[_ROW_BETAE:_ROW_BETAE + 1, :de]

    # dropout(p=0.0) is the identity.
    vout_ref[...] = bn_leaky_res(v_lin, gv, betav, v_in)
    eout_ref[...] = bn_leaky_res(e_lin, ge, betae, e_in)


# ------------------------------- wrappers ------------------------------------
def precompute_graph(src, dst, n_nodes):
    """Graph-structure preprocessing, done ONCE per graph (outside hot path):
    dense row-normalised adjacency for mean aggregation and a stacked one-hot
    [src; dst] gather matrix for the single MXU-based edge gather."""
    a_count = jnp.zeros((n_nodes, n_nodes), jnp.float32).at[dst, src].add(1.0)
    deg = jnp.sum(a_count, axis=1, keepdims=True)
    a_mean = a_count / jnp.maximum(deg, 1.0)
    s_src = jax.nn.one_hot(src, n_nodes, dtype=jnp.float32)   # (M, N)
    s_dst = jax.nn.one_hot(dst, n_nodes, dtype=jnp.float32)   # (M, N)
    s_gather = jnp.concatenate([s_src, s_dst], axis=0)        # (2M, N)
    return a_mean, s_gather


def pack_params(params, d, de):
    """Pack the six tiny bias/BN vectors into one (8,128) VMEM slab (1 DMA)."""
    assert d <= 128 and de <= 128
    pp = jnp.zeros((8, 128), jnp.float32)
    pp = pp.at[_ROW_BV, :d].set(params["bv"].reshape(-1))
    pp = pp.at[_ROW_GV, :d].set(params["gv"].reshape(-1))
    pp = pp.at[_ROW_BETAV, :d].set(params["betav"].reshape(-1))
    pp = pp.at[_ROW_BS, :de].set(params["bs"].reshape(-1))
    pp = pp.at[_ROW_GE, :de].set(params["ge"].reshape(-1))
    pp = pp.at[_ROW_BETAE, :de].set(params["betae"].reshape(-1))
    return pp


def cell_forward(params, weight, a_mean_b, s_gather_b, v_in_b, e_in_b):
    """B independent Cell forwards in one pallas_call, grid=(B,)."""
    b, n, d = v_in_b.shape
    _, m, de = e_in_b.shape
    wv, ws = params["Wv"], params["Ws"]
    pp = pack_params(params, d, de)

    kernel = functools.partial(_cell_kernel, links=LINKS, node_dim=d,
                               edge_dim=de, slope=LEAKY_SLOPE, eps=BN_EPS)

    smem = pltpu.MemorySpace.SMEM
    in_specs = [
        pl.BlockSpec(memory_space=smem),                           # weight (A,3)
        pl.BlockSpec((None, n, n), lambda i: (i, 0, 0)),           # A_mean
        pl.BlockSpec((None, 2 * m, n), lambda i: (i, 0, 0)),       # stacked one-hot
        pl.BlockSpec((None, n, d), lambda i: (i, 0, 0)),           # V_in
        pl.BlockSpec((None, m, de), lambda i: (i, 0, 0)),          # E_in
        pl.BlockSpec(wv.shape, lambda i: (0, 0)),                  # Wv (shared)
        pl.BlockSpec(ws.shape, lambda i: (0, 0)),                  # Ws (shared)
        pl.BlockSpec((8, 128), lambda i: (0, 0)),                  # packed params
    ]
    out_specs = (
        pl.BlockSpec((None, n, d), lambda i: (i, 0, 0)),
        pl.BlockSpec((None, m, de), lambda i: (i, 0, 0)),
    )
    out_shape = (jax.ShapeDtypeStruct((b, n, d), jnp.float32),
                 jax.ShapeDtypeStruct((b, m, de), jnp.float32))

    # Advisory cost estimate so XLA schedules the custom call sensibly.
    uniq_srcs = len({s for dst_links in LINKS for (s, _w) in dst_links})
    flops_per = (2 * uniq_srcs * n * n * d          # memoized aggregations
                 + 8 * len(CELL_ARCH) * n * d       # mixed-op elementwise
                 + 2 * n * (NB_NODES * d) * d       # trans_concat_V
                 + 2 * (2 * m) * n * d              # stacked one-hot gather
                 + 2 * m * (2 * d + de) * de        # S linear
                 + 12 * (n * d + m * de))           # BN / leaky / residual
    bytes_accessed = 4 * (int(weight.size) + int(a_mean_b.size)
                          + int(s_gather_b.size) + int(v_in_b.size)
                          + int(e_in_b.size) + int(wv.size) + int(ws.size)
                          + 8 * 128 + b * n * d + b * m * de)

    return pl.pallas_call(
        kernel,
        grid=(b,),
        in_specs=in_specs,
        out_specs=out_specs,
        out_shape=out_shape,
        compiler_params=pltpu.CompilerParams(
            dimension_semantics=("parallel",)),
        cost_estimate=pl.CostEstimate(flops=int(b * flops_per),
                                      transcendentals=int(b * (d + de)),
                                      bytes_accessed=int(bytes_accessed)),
    )(weight, a_mean_b, s_gather_b, v_in_b, e_in_b, wv, ws, pp)


# ----------------------------- pure-JAX reference ----------------------------
def mixed_op(v, src, dst, n_nodes, w):
    # Stand-in for the external Mixed module: {zero, identity, mean-aggregation}.
    agg_sum = jax.ops.segment_sum(v[src], dst, num_segments=n_nodes)
    deg = jax.ops.segment_sum(jnp.ones((src.shape[0],), v.dtype), dst,
                              num_segments=n_nodes)
    agg_mean = agg_sum / jnp.maximum(deg, 1.0)[:, None]
    return w[0] * jnp.zeros_like(v) + w[1] * v + w[2] * agg_mean


def cell_states(link_dict, src, dst, v_in, weight):
    n = v_in.shape[0]
    states = [v_in]
    for d in range(1, NB_NODES + 1):
        acc = 0.0
        for s, w in link_dict[d]:
            acc = acc + mixed_op(states[s], src, dst, n, weight[w])
        states.append(acc)
    return states


def _leaky(x):
    return jnp.where(x >= 0, x, LEAKY_SLOPE * x)


def _bn(x, g, b):
    m = x.mean(0, keepdims=True)
    var = ((x - m) ** 2).mean(0, keepdims=True)
    return (x - m) / jnp.sqrt(var + BN_EPS) * g + b


def reference_forward(params, src, dst, v_in, e_in, weight):
    states = cell_states(LINK_DICT, src, dst, v_in, weight)
    vcat = jnp.concatenate(states[1:], axis=1)
    hp = jax.lax.Precision.HIGHEST
    v_lin = jnp.dot(vcat, params["Wv"], precision=hp) + params["bv"]
    e_act = _leaky(e_in)
    xe = jnp.concatenate([v_lin[src], e_act, v_lin[dst]], axis=1)
    e_lin = jnp.dot(xe, params["Ws"], precision=hp) + params["bs"]
    v = _leaky(_bn(v_lin, params["gv"], params["betav"])) + v_in
    e = _leaky(_bn(e_lin, params["ge"], params["betae"])) + e_in
    return v, e


# ---------------------------------- main --------------------------------------
if __name__ == "__main__":
    key = jax.random.PRNGKey(0)
    k_v, k_e, k_w, k_wv, k_ws = jax.random.split(key, 5)

    B = 4                      # independent Cell forwards batched over the grid
    N = 16                     # nodes per graph
    D, De = NODE_DIM, EDGE_DIM
    M = 2 * N                  # edges per graph

    # small deterministic directed graphs: ring + per-batch skip edges
    i = jnp.arange(N, dtype=jnp.int32)
    src_list, dst_list, a_list, g_list = [], [], [], []
    for bi in range(B):
        skip = 2 + bi
        src = jnp.concatenate([i, i])
        dst = jnp.concatenate([(i + 1) % N, (i + skip) % N])
        a_mean, s_gather = precompute_graph(src, dst, N)   # once per graph
        src_list.append(src)
        dst_list.append(dst)
        a_list.append(a_mean)
        g_list.append(s_gather)
    a_mean_b = jnp.stack(a_list)        # (B, N, N)
    s_gather_b = jnp.stack(g_list)      # (B, 2M, N)

    v_in = jax.random.normal(k_v, (B, N, D), dtype=jnp.float32)
    e_in = jax.random.normal(k_e, (B, M, De), dtype=jnp.float32)

    # architecture weights: one row of op-mixing weights per cell_arch entry
    weight = jax.nn.softmax(jax.random.normal(k_w, (len(CELL_ARCH), NUM_OPS)),
                            axis=-1)

    # parameters (shapes from the module's __init__), deterministic init.
    # trans_concat_V: Linear(NB_NODES*D -> D); S: Linear(2D + De -> De).
    Wv = 0.1 * jax.random.normal(k_wv, (NB_NODES * D, D), dtype=jnp.float32)
    Ws = 0.1 * jax.random.normal(k_ws, (2 * D + De, De), dtype=jnp.float32)
    params = {
        "Wv": Wv, "bv": jnp.zeros((1, D), jnp.float32),
        "Ws": Ws, "bs": jnp.zeros((1, De), jnp.float32),
        # BatchNorm1d defaults: gamma = 1, beta = 0
        "gv": jnp.ones((1, D), jnp.float32), "betav": jnp.zeros((1, D), jnp.float32),
        "ge": jnp.ones((1, De), jnp.float32), "betae": jnp.zeros((1, De), jnp.float32),
    }

    v_out, e_out = cell_forward(params, weight, a_mean_b, s_gather_b, v_in, e_in)
    jax.block_until_ready((v_out, e_out))

    # per-item pure-JAX reference
    v_refs, e_refs = [], []
    for bi in range(B):
        vr, er = reference_forward(params, src_list[bi], dst_list[bi],
                                   v_in[bi], e_in[bi], weight)
        v_refs.append(vr)
        e_refs.append(er)
    v_ref = jnp.stack(v_refs)
    e_ref = jnp.stack(e_refs)

    assert v_out.shape == (B, N, D) and e_out.shape == (B, M, De)
    assert jnp.allclose(v_out, v_ref, atol=1e-2, rtol=1e-2)
    assert jnp.allclose(e_out, e_ref, atol=1e-2, rtol=1e-2)

    print("KERNEL_OK")
</pallas_src>

<mosaic_0001>
module attributes {stable_mosaic.version = 11 : i64} {
  func.func @_cell_kernel(%arg0: i32, %arg1: memref<7x3xf32, #tpu.memory_space<smem>>, %arg2: memref<1x16x16xf32, #tpu.memory_space<vmem>>, %arg3: memref<1x64x16xf32, #tpu.memory_space<vmem>>, %arg4: memref<1x16x32xf32, #tpu.memory_space<vmem>>, %arg5: memref<1x32x32xf32, #tpu.memory_space<vmem>>, %arg6: memref<128x32xf32, #tpu.memory_space<vmem>>, %arg7: memref<96x32xf32, #tpu.memory_space<vmem>>, %arg8: memref<8x128xf32, #tpu.memory_space<vmem>>, %arg9: memref<1x16x32xf32, #tpu.memory_space<vmem>>, %arg10: memref<1x32x32xf32, #tpu.memory_space<vmem>>) attributes {dimension_semantics = [#tpu.dimension_semantics<parallel>], iteration_bounds = array<i64: 4>, scalar_prefetch = 0 : i64, scratch_operands = 0 : i64, tpu.core_type = #tpu.core_type<tc>, window_params = [{transform_indices = @transform_0, window_bounds = array<i64: 7, 3>}, {transform_indices = @transform_1, window_bounds = array<i64: 1, 16, 16>}, {transform_indices = @transform_2, window_bounds = array<i64: 1, 64, 16>}, {transform_indices = @transform_3, window_bounds = array<i64: 1, 16, 32>}, {transform_indices = @transform_4, window_bounds = array<i64: 1, 32, 32>}, {pipeline_mode = #tpu.pipeline_mode<synchronous>, transform_indices = @transform_5, window_bounds = array<i64: 128, 32>}, {pipeline_mode = #tpu.pipeline_mode<synchronous>, transform_indices = @transform_6, window_bounds = array<i64: 96, 32>}, {pipeline_mode = #tpu.pipeline_mode<synchronous>, transform_indices = @transform_7, window_bounds = array<i64: 8, 128>}, {transform_indices = @transform_8, window_bounds = array<i64: 1, 16, 32>}, {transform_indices = @transform_9, window_bounds = array<i64: 1, 32, 32>}]} {
    %c0 = arith.constant 0 : index
    %c0_0 = arith.constant 0 : index
    %c0_1 = arith.constant 0 : index
    %0 = vector.load %arg4[%c0, %c0_0, %c0_1] : memref<1x16x32xf32, #tpu.memory_space<vmem>>, vector<1x16x32xf32>
    %1 = vector.shape_cast %0 : vector<1x16x32xf32> to vector<16x32xf32>
    %c0_2 = arith.constant 0 : index
    %c0_3 = arith.constant 0 : index
    %c0_4 = arith.constant 0 : index
    %2 = vector.load %arg5[%c0_2, %c0_3, %c0_4] : memref<1x32x32xf32, #tpu.memory_space<vmem>>, vector<1x32x32xf32>
    %3 = vector.shape_cast %2 : vector<1x32x32xf32> to vector<32x32xf32>
    %c0_5 = arith.constant 0 : index
    %c0_6 = arith.constant 0 : index
    %c0_7 = arith.constant 0 : index
    %4 = vector.load %arg2[%c0_5, %c0_6, %c0_7] : memref<1x16x16xf32, #tpu.memory_space<vmem>>, vector<1x16x16xf32>
    %5 = vector.shape_cast %4 : vector<1x16x16xf32> to vector<16x16xf32>
    %c0_8 = arith.constant 0 : index
    %c1 = arith.constant 1 : index
    %6 = memref.load %arg1[%c0_8, %c1] : memref<7x3xf32, #tpu.memory_space<smem>>
    %7 = vector.broadcast %6 : f32 to vector<16x32xf32>
    %8 = arith.mulf %7, %1 : vector<16x32xf32>
    %c0_9 = arith.constant 0 : index
    %c2 = arith.constant 2 : index
    %9 = memref.load %arg1[%c0_9, %c2] : memref<7x3xf32, #tpu.memory_space<smem>>
    %cst = arith.constant dense<0.000000e+00> : vector<16x32xf32>
    %10 = tpu.matmul %5, %1, %cst {dimension_numbers = #tpu.dot_dimension_numbers<[1], [0], [0], [1], [0, 0, 1, 1], [], []>} : vector<16x16xf32>, vector<16x32xf32>, vector<16x32xf32> -> vector<16x32xf32>
    %11 = vector.broadcast %9 : f32 to vector<16x32xf32>
    %12 = arith.mulf %11, %10 : vector<16x32xf32>
    %13 = arith.addf %8, %12 : vector<16x32xf32>
    %c1_10 = arith.constant 1 : index
    %c1_11 = arith.constant 1 : index
    %14 = memref.load %arg1[%c1_10, %c1_11] : memref<7x3xf32, #tpu.memory_space<smem>>
    %15 = vector.broadcast %14 : f32 to vector<16x32xf32>
    %16 = arith.mulf %15, %1 : vector<16x32xf32>
    %c1_12 = arith.constant 1 : index
    %c2_13 = arith.constant 2 : index
    %17 = memref.load %arg1[%c1_12, %c2_13] : memref<7x3xf32, #tpu.memory_space<smem>>
    %18 = vector.broadcast %17 : f32 to vector<16x32xf32>
    %19 = arith.mulf %18, %10 : vector<16x32xf32>
    %20 = arith.addf %16, %19 : vector<16x32xf32>
    %c2_14 = arith.constant 2 : index
    %c1_15 = arith.constant 1 : index
    %21 = memref.load %arg1[%c2_14, %c1_15] : memref<7x3xf32, #tpu.memory_space<smem>>
    %22 = vector.broadcast %21 : f32 to vector<16x32xf32>
    %23 = arith.mulf %22, %13 : vector<16x32xf32>
    %c2_16 = arith.constant 2 : index
    %c2_17 = arith.constant 2 : index
    %24 = memref.load %arg1[%c2_16, %c2_17] : memref<7x3xf32, #tpu.memory_space<smem>>
    %cst_18 = arith.constant dense<0.000000e+00> : vector<16x32xf32>
    %25 = tpu.matmul %5, %13, %cst_18 {dimension_numbers = #tpu.dot_dimension_numbers<[1], [0], [0], [1], [0, 0, 1, 1], [], []>} : vector<16x16xf32>, vector<16x32xf32>, vector<16x32xf32> -> vector<16x32xf32>
    %26 = vector.broadcast %24 : f32 to vector<16x32xf32>
    %27 = arith.mulf %26, %25 : vector<16x32xf32>
    %28 = arith.addf %23, %27 : vector<16x32xf32>
    %29 = arith.addf %20, %28 : vector<16x32xf32>
    %c3 = arith.constant 3 : index
    %c1_19 = arith.constant 1 : index
    %30 = memref.load %arg1[%c3, %c1_19] : memref<7x3xf32, #tpu.memory_space<smem>>
    %31 = vector.broadcast %30 : f32 to vector<16x32xf32>
    %32 = arith.mulf %31, %13 : vector<16x32xf32>
    %c3_20 = arith.constant 3 : index
    %c2_21 = arith.constant 2 : index
    %33 = memref.load %arg1[%c3_20, %c2_21] : memref<7x3xf32, #tpu.memory_space<smem>>
    %34 = vector.broadcast %33 : f32 to vector<16x32xf32>
    %35 = arith.mulf %34, %25 : vector<16x32xf32>
    %36 = arith.addf %32, %35 : vector<16x32xf32>
    %c4 = arith.constant 4 : index
    %c1_22 = arith.constant 1 : index
    %37 = memref.load %arg1[%c4, %c1_22] : memref<7x3xf32, #tpu.memory_space<smem>>
    %38 = vector.broadcast %37 : f32 to vector<16x32xf32>
    %39 = arith.mulf %38, %29 : vector<16x32xf32>
    %c4_23 = arith.constant 4 : index
    %c2_24 = arith.constant 2 : index
    %40 = memref.load %arg1[%c4_23, %c2_24] : memref<7x3xf32, #tpu.memory_space<smem>>
    %cst_25 = arith.constant dense<0.000000e+00> : vector<16x32xf32>
    %41 = tpu.matmul %5, %29, %cst_25 {dimension_numbers = #tpu.dot_dimension_numbers<[1], [0], [0], [1], [0, 0, 1, 1], [], []>} : vector<16x16xf32>, vector<16x32xf32>, vector<16x32xf32> -> vector<16x32xf32>
    %42 = vector.broadcast %40 : f32 to vector<16x32xf32>
    %43 = arith.mulf %42, %41 : vector<16x32xf32>
    %44 = arith.addf %39, %43 : vector<16x32xf32>
    %45 = arith.addf %36, %44 : vector<16x32xf32>
    %c5 = arith.constant 5 : index
    %c1_26 = arith.constant 1 : index
    %46 = memref.load %arg1[%c5, %c1_26] : memref<7x3xf32, #tpu.memory_space<smem>>
    %47 = vector.broadcast %46 : f32 to vector<16x32xf32>
    %48 = arith.mulf %47, %1 : vector<16x32xf32>
    %c5_27 = arith.constant 5 : index
    %c2_28 = arith.constant 2 : index
    %49 = memref.load %arg1[%c5_27, %c2_28] : memref<7x3xf32, #tpu.memory_space<smem>>
    %50 = vector.broadcast %49 : f32 to vector<16x32xf32>
    %51 = arith.mulf %50, %10 : vector<16x32xf32>
    %52 = arith.addf %48, %51 : vector<16x32xf32>
    %c6 = arith.constant 6 : index
    %c1_29 = arith.constant 1 : index
    %53 = memref.load %arg1[%c6, %c1_29] : memref<7x3xf32, #tpu.memory_space<smem>>
    %54 = vector.broadcast %53 : f32 to vector<16x32xf32>
    %55 = arith.mulf %54, %45 : vector<16x32xf32>
    %c6_30 = arith.constant 6 : index
    %c2_31 = arith.constant 2 : index
    %56 = memref.load %arg1[%c6_30, %c2_31] : memref<7x3xf32, #tpu.memory_space<smem>>
    %cst_32 = arith.constant dense<0.000000e+00> : vector<16x32xf32>
    %57 = tpu.matmul %5, %45, %cst_32 {dimension_numbers = #tpu.dot_dimension_numbers<[1], [0], [0], [1], [0, 0, 1, 1], [], []>} : vector<16x16xf32>, vector<16x32xf32>, vector<16x32xf32> -> vector<16x32xf32>
    %58 = vector.broadcast %56 : f32 to vector<16x32xf32>
    %59 = arith.mulf %58, %57 : vector<16x32xf32>
    %60 = arith.addf %55, %59 : vector<16x32xf32>
    %61 = arith.addf %52, %60 : vector<16x32xf32>
    %c0_33 = arith.constant 0 : index
    %c0_34 = arith.constant 0 : index
    %62 = vector.load %arg8[%c0_33, %c0_34] : memref<8x128xf32, #tpu.memory_space<vmem>>, vector<1x32xf32>
    %c0_35 = arith.constant 0 : index
    %c0_36 = arith.constant 0 : index
    %63 = vector.load %arg6[%c0_35, %c0_36] : memref<128x32xf32, #tpu.memory_space<vmem>>, vector<32x32xf32>
    %cst_37 = arith.constant dense<0.000000e+00> : vector<16x32xf32>
    %64 = tpu.matmul %13, %63, %cst_37 {dimension_numbers = #tpu.dot_dimension_numbers<[1], [0], [0], [1], [0, 0, 1, 1], [], []>} : vector<16x32xf32>, vector<32x32xf32>, vector<16x32xf32> -> vector<16x32xf32>
    %65 = vector.broadcast %62 : vector<1x32xf32> to vector<16x32xf32>
    %66 = arith.addf %65, %64 : vector<16x32xf32>
    %c32 = arith.constant 32 : index
    %c0_38 = arith.constant 0 : index
    %67 = vector.load %arg6[%c32, %c0_38] : memref<128x32xf32, #tpu.memory_space<vmem>>, vector<32x32xf32>
    %cst_39 = arith.constant dense<0.000000e+00> : vector<16x32xf32>
    %68 = tpu.matmul %29, %67, %cst_39 {dimension_numbers = #tpu.dot_dimension_numbers<[1], [0], [0], [1], [0, 0, 1, 1], [], []>} : vector<16x32xf32>, vector<32x32xf32>, vector<16x32xf32> -> vector<16x32xf32>
    %69 = arith.addf %66, %68 : vector<16x32xf32>
    %c64 = arith.constant 64 : index
    %c0_40 = arith.constant 0 : index
    %70 = vector.load %arg6[%c64, %c0_40] : memref<128x32xf32, #tpu.memory_space<vmem>>, vector<32x32xf32>
    %cst_41 = arith.constant dense<0.000000e+00> : vector<16x32xf32>
    %71 = tpu.matmul %45, %70, %cst_41 {dimension_numbers = #tpu.dot_dimension_numbers<[1], [0], [0], [1], [0, 0, 1, 1], [], []>} : vector<16x32xf32>, vector<32x32xf32>, vector<16x32xf32> -> vector<16x32xf32>
    %72 = arith.addf %69, %71 : vector<16x32xf32>
    %c96 = arith.constant 96 : index
    %c0_42 = arith.constant 0 : index
    %73 = vector.load %arg6[%c96, %c0_42] : memref<128x32xf32, #tpu.memory_space<vmem>>, vector<32x32xf32>
    %cst_43 = arith.constant dense<0.000000e+00> : vector<16x32xf32>
    %74 = tpu.matmul %61, %73, %cst_43 {dimension_numbers = #tpu.dot_dimension_numbers<[1], [0], [0], [1], [0, 0, 1, 1], [], []>} : vector<16x32xf32>, vector<32x32xf32>, vector<16x32xf32> -> vector<16x32xf32>
    %75 = arith.addf %72, %74 : vector<16x32xf32>
    %c0_44 = arith.constant 0 : index
    %c0_45 = arith.constant 0 : index
    %c0_46 = arith.constant 0 : index
    %76 = vector.load %arg3[%c0_44, %c0_45, %c0_46] : memref<1x64x16xf32, #tpu.memory_space<vmem>>, vector<1x64x16xf32>
    %77 = vector.shape_cast %76 : vector<1x64x16xf32> to vector<64x16xf32>
    %cst_47 = arith.constant dense<0.000000e+00> : vector<64x32xf32>
    %78 = tpu.matmul %77, %75, %cst_47 {dimension_numbers = #tpu.dot_dimension_numbers<[1], [0], [0], [1], [0, 0, 1, 1], [], []>} : vector<64x16xf32>, vector<16x32xf32>, vector<64x32xf32> -> vector<64x32xf32>
    %79 = vector.extract_strided_slice %78 {offsets = [0, 0], sizes = [32, 32], strides = [1, 1]} : vector<64x32xf32> to vector<32x32xf32>
    %80 = vector.extract_strided_slice %78 {offsets = [32, 0], sizes = [32, 32], strides = [1, 1]} : vector<64x32xf32> to vector<32x32xf32>
    %cst_48 = arith.constant 0.000000e+00 : f32
    %81 = vector.broadcast %cst_48 : f32 to vector<32x32xf32>
    %82 = arith.cmpf oge, %3, %81 : vector<32x32xf32>
    %cst_49 = arith.constant 2.000000e-01 : f32
    %83 = vector.broadcast %cst_49 : f32 to vector<32x32xf32>
    %84 = arith.mulf %83, %3 : vector<32x32xf32>
    %85 = arith.select %82, %3, %84 : vector<32x32xi1>, vector<32x32xf32>
    %c3_50 = arith.constant 3 : index
    %c0_51 = arith.constant 0 : index
    %86 = vector.load %arg8[%c3_50, %c0_51] : memref<8x128xf32, #tpu.memory_space<vmem>>, vector<1x32xf32>
    %c0_52 = arith.constant 0 : index
    %c0_53 = arith.constant 0 : index
    %87 = vector.load %arg7[%c0_52, %c0_53] : memref<96x32xf32, #tpu.memory_space<vmem>>, vector<32x32xf32>
    %cst_54 = arith.constant dense<0.000000e+00> : vector<32x32xf32>
    %88 = tpu.matmul %79, %87, %cst_54 {dimension_numbers = #tpu.dot_dimension_numbers<[1], [0], [0], [1], [0, 0, 1, 1], [], []>} : vector<32x32xf32>, vector<32x32xf32>, vector<32x32xf32> -> vector<32x32xf32>
    %c32_55 = arith.constant 32 : index
    %c0_56 = arith.constant 0 : index
    %89 = vector.load %arg7[%c32_55, %c0_56] : memref<96x32xf32, #tpu.memory_space<vmem>>, vector<32x32xf32>
    %cst_57 = arith.constant dense<0.000000e+00> : vector<32x32xf32>
    %90 = tpu.matmul %85, %89, %cst_57 {dimension_numbers = #tpu.dot_dimension_numbers<[1], [0], [0], [1], [0, 0, 1, 1], [], []>} : vector<32x32xf32>, vector<32x32xf32>, vector<32x32xf32> -> vector<32x32xf32>
    %91 = arith.addf %88, %90 : vector<32x32xf32>
    %c64_58 = arith.constant 64 : index
    %c0_59 = arith.constant 0 : index
    %92 = vector.load %arg7[%c64_58, %c0_59] : memref<96x32xf32, #tpu.memory_space<vmem>>, vector<32x32xf32>
    %cst_60 = arith.constant dense<0.000000e+00> : vector<32x32xf32>
    %93 = tpu.matmul %80, %92, %cst_60 {dimension_numbers = #tpu.dot_dimension_numbers<[1], [0], [0], [1], [0, 0, 1, 1], [], []>} : vector<32x32xf32>, vector<32x32xf32>, vector<32x32xf32> -> vector<32x32xf32>
    %94 = arith.addf %91, %93 : vector<32x32xf32>
    %95 = vector.broadcast %86 : vector<1x32xf32> to vector<32x32xf32>
    %96 = arith.addf %94, %95 : vector<32x32xf32>
    %c1_61 = arith.constant 1 : index
    %c0_62 = arith.constant 0 : index
    %97 = vector.load %arg8[%c1_61, %c0_62] : memref<8x128xf32, #tpu.memory_space<vmem>>, vector<1x32xf32>
    %c2_63 = arith.constant 2 : index
    %c0_64 = arith.constant 0 : index
    %98 = vector.load %arg8[%c2_63, %c0_64] : memref<8x128xf32, #tpu.memory_space<vmem>>, vector<1x32xf32>
    %c4_65 = arith.constant 4 : index
    %c0_66 = arith.constant 0 : index
    %99 = vector.load %arg8[%c4_65, %c0_66] : memref<8x128xf32, #tpu.memory_space<vmem>>, vector<1x32xf32>
    %c5_67 = arith.constant 5 : index
    %c0_68 = arith.constant 0 : index
    %100 = vector.load %arg8[%c5_67, %c0_68] : memref<8x128xf32, #tpu.memory_space<vmem>>, vector<1x32xf32>
    %cst_69 = arith.constant dense<0.000000e+00> : vector<32xf32>
    %101 = vector.multi_reduction <add>, %75, %cst_69 [0] : vector<16x32xf32> to vector<32xf32>
    %102 = vector.shape_cast %101 : vector<32xf32> to vector<1x32xf32>
    %cst_70 = arith.constant 6.250000e-02 : f32
    %103 = vector.broadcast %cst_70 : f32 to vector<1x32xf32>
    %104 = arith.mulf %102, %103 : vector<1x32xf32>
    %105 = vector.broadcast %104 : vector<1x32xf32> to vector<16x32xf32>
    %106 = arith.subf %75, %105 : vector<16x32xf32>
    %107 = arith.mulf %106, %106 : vector<16x32xf32>
    %cst_71 = arith.constant dense<0.000000e+00> : vector<32xf32>
    %108 = vector.multi_reduction <add>, %107, %cst_71 [0] : vector<16x32xf32> to vector<32xf32>
    %109 = vector.shape_cast %108 : vector<32xf32> to vector<1x32xf32>
    %cst_72 = arith.constant 6.250000e-02 : f32
    %110 = vector.broadcast %cst_72 : f32 to vector<1x32xf32>
    %111 = arith.mulf %109, %110 : vector<1x32xf32>
    %cst_73 = arith.constant 9.99999974E-6 : f32
    %112 = vector.broadcast %cst_73 : f32 to vector<1x32xf32>
    %113 = arith.addf %111, %112 : vector<1x32xf32>
    %114 = math.rsqrt %113 : vector<1x32xf32>
    %115 = vector.broadcast %114 : vector<1x32xf32> to vector<16x32xf32>
    %116 = arith.mulf %106, %115 : vector<16x32xf32>
    %117 = vector.broadcast %97 : vector<1x32xf32> to vector<16x32xf32>
    %118 = arith.mulf %116, %117 : vector<16x32xf32>
    %119 = vector.broadcast %98 : vector<1x32xf32> to vector<16x32xf32>
    %120 = arith.addf %118, %119 : vector<16x32xf32>
    %cst_74 = arith.constant 0.000000e+00 : f32
    %121 = vector.broadcast %cst_74 : f32 to vector<16x32xf32>
    %122 = arith.cmpf oge, %120, %121 : vector<16x32xf32>
    %cst_75 = arith.constant 2.000000e-01 : f32
    %123 = vector.broadcast %cst_75 : f32 to vector<16x32xf32>
    %124 = arith.mulf %123, %120 : vector<16x32xf32>
    %125 = arith.select %122, %120, %124 : vector<16x32xi1>, vector<16x32xf32>
    %126 = arith.addf %125, %1 : vector<16x32xf32>
    %c0_76 = arith.constant 0 : index
    %c0_77 = arith.constant 0 : index
    %c0_78 = arith.constant 0 : index
    %127 = vector.load %arg9[%c0_76, %c0_77, %c0_78] : memref<1x16x32xf32, #tpu.memory_space<vmem>>, vector<1x16x32xf32>
    %128 = vector.shape_cast %127 : vector<1x16x32xf32> to vector<16x32xf32>
    %129 = vector.shape_cast %126 : vector<16x32xf32> to vector<1x16x32xf32>
    tpu.vector_store %arg9[%c0_76, %c0_77, %c0_78], %129 {strides = array<i32>} : memref<1x16x32xf32, #tpu.memory_space<vmem>>, vector<1x16x32xf32>,
    %cst_79 = arith.constant dense<0.000000e+00> : vector<32xf32>
    %130 = vector.multi_reduction <add>, %96, %cst_79 [0] : vector<32x32xf32> to vector<32xf32>
    %131 = vector.shape_cast %130 : vector<32xf32> to vector<1x32xf32>
    %cst_80 = arith.constant 3.125000e-02 : f32
    %132 = vector.broadcast %cst_80 : f32 to vector<1x32xf32>
    %133 = arith.mulf %131, %132 : vector<1x32xf32>
    %134 = vector.broadcast %133 : vector<1x32xf32> to vector<32x32xf32>
    %135 = arith.subf %96, %134 : vector<32x32xf32>
    %136 = arith.mulf %135, %135 : vector<32x32xf32>
    %cst_81 = arith.constant dense<0.000000e+00> : vector<32xf32>
    %137 = vector.multi_reduction <add>, %136, %cst_81 [0] : vector<32x32xf32> to vector<32xf32>
    %138 = vector.shape_cast %137 : vector<32xf32> to vector<1x32xf32>
    %cst_82 = arith.constant 3.125000e-02 : f32
    %139 = vector.broadcast %cst_82 : f32 to vector<1x32xf32>
    %140 = arith.mulf %138, %139 : vector<1x32xf32>
    %cst_83 = arith.constant 9.99999974E-6 : f32
    %141 = vector.broadcast %cst_83 : f32 to vector<1x32xf32>
    %142 = arith.addf %140, %141 : vector<1x32xf32>
    %143 = math.rsqrt %142 : vector<1x32xf32>
    %144 = vector.broadcast %143 : vector<1x32xf32> to vector<32x32xf32>
    %145 = arith.mulf %135, %144 : vector<32x32xf32>
    %146 = vector.broadcast %99 : vector<1x32xf32> to vector<32x32xf32>
    %147 = arith.mulf %145, %146 : vector<32x32xf32>
    %148 = vector.broadcast %100 : vector<1x32xf32> to vector<32x32xf32>
    %149 = arith.addf %147, %148 : vector<32x32xf32>
    %cst_84 = arith.constant 0.000000e+00 : f32
    %150 = vector.broadcast %cst_84 : f32 to vector<32x32xf32>
    %151 = arith.cmpf oge, %149, %150 : vector<32x32xf32>
    %cst_85 = arith.constant 2.000000e-01 : f32
    %152 = vector.broadcast %cst_85 : f32 to vector<32x32xf32>
    %153 = arith.mulf %152, %149 : vector<32x32xf32>
    %154 = arith.select %151, %149, %153 : vector<32x32xi1>, vector<32x32xf32>
    %155 = arith.addf %154, %3 : vector<32x32xf32>
    %c0_86 = arith.constant 0 : index
    %c0_87 = arith.constant 0 : index
    %c0_88 = arith.constant 0 : index
    %156 = vector.load %arg10[%c0_86, %c0_87, %c0_88] : memref<1x32x32xf32, #tpu.memory_space<vmem>>, vector<1x32x32xf32>
    %157 = vector.shape_cast %156 : vector<1x32x32xf32> to vector<32x32xf32>
    %158 = vector.shape_cast %155 : vector<32x32xf32> to vector<1x32x32xf32>
    tpu.vector_store %arg10[%c0_86, %c0_87, %c0_88], %158 {strides = array<i32>} : memref<1x32x32xf32, #tpu.memory_space<vmem>>, vector<1x32x32xf32>,
    return
  }
  func.func @transform_0(%arg0: i32) -> (i32, i32) {
    %c0_i32 = arith.constant 0 : i32
    %c0_i32_0 = arith.constant 0 : i32
    %c0_i32_1 = arith.constant 0 : i32
    return %c0_i32, %c0_i32_0 : i32, i32
  }
  func.func @transform_1(%arg0: i32) -> (i32, i32, i32) {
    %c0_i32 = arith.constant 0 : i32
    %c0_i32_0 = arith.constant 0 : i32
    %c0_i32_1 = arith.constant 0 : i32
    return %arg0, %c0_i32, %c0_i32_0 : i32, i32, i32
  }
  func.func @transform_2(%arg0: i32) -> (i32, i32, i32) {
    %c0_i32 = arith.constant 0 : i32
    %c0_i32_0 = arith.constant 0 : i32
    %c0_i32_1 = arith.constant 0 : i32
    return %arg0, %c0_i32, %c0_i32_0 : i32, i32, i32
  }
  func.func @transform_3(%arg0: i32) -> (i32, i32, i32) {
    %c0_i32 = arith.constant 0 : i32
    %c0_i32_0 = arith.constant 0 : i32
    %c0_i32_1 = arith.constant 0 : i32
    return %arg0, %c0_i32, %c0_i32_0 : i32, i32, i32
  }
  func.func @transform_4(%arg0: i32) -> (i32, i32, i32) {
    %c0_i32 = arith.constant 0 : i32
    %c0_i32_0 = arith.constant 0 : i32
    %c0_i32_1 = arith.constant 0 : i32
    return %arg0, %c0_i32, %c0_i32_0 : i32, i32, i32
  }
  func.func @transform_5(%arg0: i32) -> (i32, i32) {
    %c0_i32 = arith.constant 0 : i32
    %c0_i32_0 = arith.constant 0 : i32
    %c0_i32_1 = arith.constant 0 : i32
    return %c0_i32, %c0_i32_0 : i32, i32
  }
  func.func @transform_6(%arg0: i32) -> (i32, i32) {
    %c0_i32 = arith.constant 0 : i32
    %c0_i32_0 = arith.constant 0 : i32
    %c0_i32_1 = arith.constant 0 : i32
    return %c0_i32, %c0_i32_0 : i32, i32
  }
  func.func @transform_7(%arg0: i32) -> (i32, i32) {
    %c0_i32 = arith.constant 0 : i32
    %c0_i32_0 = arith.constant 0 : i32
    %c0_i32_1 = arith.constant 0 : i32
    return %c0_i32, %c0_i32_0 : i32, i32
  }
  func.func @transform_8(%arg0: i32) -> (i32, i32, i32) {
    %c0_i32 = arith.constant 0 : i32
    %c0_i32_0 = arith.constant 0 : i32
    %c0_i32_1 = arith.constant 0 : i32
    return %arg0, %c0_i32, %c0_i32_0 : i32, i32, i32
  }
  func.func @transform_9(%arg0: i32) -> (i32, i32, i32) {
    %c0_i32 = arith.constant 0 : i32
    %c0_i32_0 = arith.constant 0 : i32
    %c0_i32_1 = arith.constant 0 : i32
    return %arg0, %c0_i32, %c0_i32_0 : i32, i32, i32
  }
}

</mosaic_0001>

<bundles_post_ra>
// kernel: tpu_custom_call.1
= control target key start
LH: loop header
LB: loop body
LE: loop exit
PB: predicated region body
PF: predicated region fallthrough
CT: control target
= control target key end

     0   :  { %15 = vsyncpa [#allocation4], 0  ;;  %s2962_s0 = inlined_call_operand.vmem [shape: f32[7,3], index: 0, kind: input, shape index: {}]   ;;  %s2963_s1 = inlined_call_operand.vmem [shape: f32[4,16,16], index: 1, kind: input, shape index: {}]   ;;  %s2964_s2 = inlined_call_operand.vmem [shape: f32[4,64,16], index: 2, kind: input, shape index: {}]   ;;  %s2965_s3 = inlined_call_operand.vmem [shape: f32[4,16,32], index: 3, kind: input, shape index: {}]   ;;  %s2966_s4 = inlined_call_operand.vmem [shape: f32[4,32,32], index: 4, kind: input, shape index: {}]   ;;  %s2967_s5 = inlined_call_operand.vmem [shape: f32[128,32], index: 5, kind: input, shape index: {}]   ;;  %s2968_s6 = inlined_call_operand.vmem [shape: f32[96,32], index: 6, kind: input, shape index: {}]   ;;  %s2969_s7 = inlined_call_operand.vmem [shape: f32[8,128], index: 7, kind: input, shape index: {}]   ;;  %s2970_s8 = inlined_call_operand.hbm [shape: f32[4,16,32], index: 8, kind: output, shape index: {0}]   ;;  %s2971_s9 = inlined_call_operand.hbm [shape: f32[4,32,32], index: 9, kind: output, shape index: {1}]  }
   0x1   :  { %16 = vsyncpa [#allocation3], 0 }
   0x2   :  { %18 = vsyncpa [#allocation3 + $0x1], 0 }
   0x3   :  { %19 = vsyncpa [#allocation7], 0 }
   0x4   :  { %21 = vsyncpa [#allocation7 + $0x1], 0  ;;  %s2548_s30 = smov 0   ;;  %s2550_s10 = smov 0  }
   0x5   :  { %s2552_s11 = smov 0   ;;  %s2554_s12 = smov 0  }
   0x6 LB: > { %s2569_s13 = sadd.s32 4294967295, %s2491_s12   ;;  %s1935_s14 = sadd.s32 4294967294, %s2491_s12   ;;  %s2491_s12 = sphi %s2554_s12, %s2979_s12   ;;  %s2487_s11 = sphi %s2552_s11, %s2978_s11   ;;  %s2483_s10 = sphi %s2550_s10, %s2977_s10   ;;  %s2479_s30 = sphi %s2548_s30, %s2976_s30  }
   0x7   : > { %s2573_s15 = sadd.s32 1, %s2491_s12   ;;  %s222_s16 = sadd.s32 1, %s2487_s11 }
   0x8   : > { %s219_s17 = ssub.s32 %s2491_s12, %s2573_s15  ;;  %p232_p0 = scmp.ne.s32.totalorder %s2487_s11, %s2483_s10 }
   0x9   : > { %p220_p1 = scmp.eq.s32.totalorder %s219_s17, 0  ;;  %p233_p2 = scmp.eq.s32.totalorder %s2569_s13, 3 }
   0xa   : > { %p238_p3 = scmp.ne.s32.totalorder %s2483_s10, %s2479_s30  ;;  %p239_p4 = scmp.eq.s32.totalorder %s1935_s14, 3 }
   0xb   : > { %s2584_s18 = scalar_select %p220_p1, %s2487_s11, %s222_s16  }
   0xc   : > { %p2586_p5 = por %p233_p2, %p232_p0  ;;  %p2590_p6 = por %p239_p4, %p238_p3 }
   0xd   : > { %p1936_p7 = scmp.ge.s32.totalorder %s2491_s12, 1  ;;  %p272_p8 = scmp.lt.s32.totalorder %s2491_s12, 5 }
   0xe   : > { %p2336_p9 = scmp.eq.s32.totalorder %s2569_s13, 0  ;;  %s285_s24 = sshll.u32 %s2962_s0, 4  ;;  %s286_s24 = int_to_ptr.vmem [resolvable:$true] %s285_s24 }
   0xf   : > { %p2597_p10 = pnand %p1936_p7, %p272_p8  ;;  %s2378_s25 = scalar_lea.vmem %s286_s24, 128 }
  0x10   : > { %p2379_p13 = scmp.ne.s32.totalorder %s286_s24, %s2378_s25  ;;  %p2386_p3 = scmp.lt.s32.totalorder %s286_s24, %s286_s24 }
  0x11   : > { %p2325_p11 = pneg %p2597_p10  ;;  %p2387_p4 = scmp.lt.s32.totalorder %s2378_s25, %s2378_s25 }
  0x13   : > { %p2326_p12 = pnand %p2336_p9, %p2325_p11  ;;  %p2388_p7 = por %p2387_p4, %p2386_p3 }
  0x15   : > { %p2380_p0 = pneg %p2326_p12 }
  0x17   : > { %p2381_p1 = pnand %p2380_p0, %p2379_p13 }
  0x19   : > { %p2382_p2 = pneg %p2381_p1 }
  0x1b   : > { %p2389_p8 = pnand %p2388_p7, %p2382_p2 }
  0x1d   : > { %2392 = shalt.err (!%p2389_p8)
}
  0x1e   : > { %s2493_s26 = smov [#allocation2]   ;;  %339 = sbr.rel (%p2597_p10) target bundleno = 1693 (0x69d), region = 52 }
  0x1f   : > { %2328 = dma.vmem_to_smem (!%p2326_p12), %s286_s24, 128, %s2493_s26, [#allocation4]  }
  0x25   : > { %2466 = dma.done.wait (%p2336_p9), [#allocation4], 128  }
  0x26   : > { %2468 = vsyncadd (%p2336_p9), [#allocation4], 4294967168 }
  0x27   : > { %345 = sfence }
  0x28   : > { %p396_p11 = scmp.lt.s32.totalorder %s2569_s13, 3  ;;  %vm429_vm0 = vcmask 130048   ;;  %s1951_s23 = sld [smem:[#allocation2 + $0x1]]  ;;  %v808_v35 = vld [vmem:[%s2967_s5] sm:$0xff]  ;;  %v809_v36 = vld [vmem:[%s2967_s5 + $0x8] sm:$0xff]  ;;  %v810_v40 = vld [vmem:[%s2967_s5 + $0x10] sm:$0xff] }
  0x29   : > { %s1952_s24 = sld [smem:[#allocation2 + $0x2]]  ;;  %s1955_s25 = sld [smem:[#allocation2 + $0x81]]  ;;  %v2241_v39 = vpack.c.bf16 %v809_v36, %v808_v35  ;;  %v811_v41 = vld [vmem:[%s2967_s5 + $0x18] sm:$0xff]  ;;  %vm812_vm1 = vcmask 261120   ;;  %v900_v43 = vld [vmem:[%s2967_s5 + $0x20] sm:$0xff]  ;;  %v901_v44 = vld [vmem:[%s2967_s5 + $0x28] sm:$0xff] }
  0x2a   : > { %s2616_s27 = scalar_select %p396_p11, %s2569_s13, 3  ;;  %v2245_v42 = vpack.c.bf16 %v811_v41, %v810_v40  ;;  %v2249_v45 = vpack.c.bf16 %v901_v44, %v900_v43  ;;  %v902_v46 = vld [vmem:[%s2967_s5 + $0x30] sm:$0xff]  ;;  %v903_v47 = vld [vmem:[%s2967_s5 + $0x38] sm:$0xff]  ;;  %v987_v49 = vld [vmem:[%s2967_s5 + $0x40] sm:$0xff] }
  0x2b   : > { %s1956_s26 = sld [smem:[#allocation2 + $0x82]]  ;;  %v2253_v48 = vpack.c.bf16 %v903_v47, %v902_v46  ;;  %v988_v50 = vld [vmem:[%s2967_s5 + $0x48] sm:$0xff]  ;;  %v989_v52 = vld [vmem:[%s2967_s5 + $0x50] sm:$0xff]  ;;  %v990_v53 = vld [vmem:[%s2967_s5 + $0x58] sm:$0xff]  ;;  %s1961_s21 = sld [smem:[#allocation2 + $0x181]] }
  0x2c   : > { %s2015_s28 = sshll.u32 %s2616_s27, 4  ;;  %s1958_s29 = sld [smem:[#allocation2 + $0x102]]  ;;  %v2257_v51 = vpack.c.bf16 %v988_v50, %v987_v49  ;;  %v2261_v54 = vpack.c.bf16 %v990_v53, %v989_v52  ;;  %v1316_v46 = vld [vmem:[%s2968_s6 + $0x28] sm:$0xff]  ;;  %v1317_v53 = vld [vmem:[%s2968_s6 + $0x30] sm:$0xff] }
  0x2d   : > { %s410_s16 = scalar_lea.vmem %s2965_s3, %s2015_s28  ;;  %s400_s22 = scalar_lea.vmem %s2963_s1, %s2015_s28 }
  0x2e   : > { %v2622_v0 = vld [vmem:[%s410_s16] sm:$0xff]  ;;  %v2624_v1 = vld [vmem:[%s410_s16 + $0x8] sm:$0xff]  ;;  %v425_v5 = vstv %s1951_s23  ;;  %s1957_s28 = sld [smem:[#allocation2 + $0x101]]  ;;  %s1962_s17 = sld [smem:[#allocation2 + $0x182]] }
  0x2f   : > { %v2225_v2 = vpack.c.bf16 %v2624_v1, %v2622_v0  ;;  %v422_v3 = vld [vmem:[%s400_s22] sm:$0xff]  ;;  %v2633_v4 = vld [vmem:[%s400_s22 + $0x8] sm:$0xff]  ;;  %v511_v6 = vstv %s1952_s24  ;;  %v427_v7 = vmul.f32 %v425_v5, %v2624_v1  ;;  %v426_v9 = vmul.f32 %v425_v5, %v2622_v0  ;;  %s1963_s22 = sld [smem:[#allocation2 + $0x201]]  ;;  %s1964_s23 = sld [smem:[#allocation2 + $0x202]] }
  0x30   : > { %2099 = vmatprep.mubr.msk.f32.mxu0 %vm429_vm0, %v422_v3  ;;  %2120 = vmatprep.mubr.msk.f32.mxu1 %vm429_vm0, %v422_v3  ;;  %v517_v16 = vstv %s1955_s25  ;;  %s1970_s24 = sld [smem:[#allocation2 + $0x302]]  ;;  %s2016_s25 = sshll.u32 %s2616_s27, 6 }
  0x31   : > { %2226 = vmatprep.subr.bf16.mxu0 %v2225_v2  ;;  %v521_v17 = vstv %s1956_s26  ;;  %v519_v20 = vmul.f32 %v517_v16, %v2624_v1  ;;  %v518_v22 = vmul.f32 %v517_v16, %v2622_v0  ;;  %v614_v56 = vstv %s1961_s21  ;;  %s1967_s21 = sld [smem:[#allocation2 + $0x281]]  ;;  %s2018_s14 = sshll.u32 %s2616_s27, 5 }
  0x32   : > { %2228 = vmatpush3.bf16.msra.mxu0 %v2225_v2  ;;  %v606_v19 = vstv %s1958_s29  ;;  %s2733_s29 = scalar_lea.vmem %s2964_s2, %s2016_s25  ;;  %s415_s27 = scalar_lea.vmem %s2966_s4, %s2018_s14 }
  0x33   : > { %s2494_s14 = smov [#allocation5]  }
  0x34   : > { %v527_v18 = vstv %s1957_s28  ;;  %v618_v55 = vstv %s1962_s17  ;;  %s2397_s16 = sshll.u32 %s2494_s14, 4  ;;  %s2398_s16 = int_to_ptr.vmem [resolvable:$false] %s2397_s16 }
  0x35   : > { %2100 = vmatmul.mubr.msk.f32.vlgmr.msra.gmra.mrb[0].mxu0 %vm429_vm0, %v2633_v4  ;;  %v624_v57 = vstv %s1963_s22  ;;  %v703_v58 = vstv %s1964_s23  ;;  %s1968_s22 = sld [smem:[#allocation2 + $0x282]]  ;;  %s1969_s23 = sld [smem:[#allocation2 + $0x301]] }
  0x36   : > { %2106 = vmatprep.mubr.msk.f32.mxu0 %vm429_vm0, %v422_v3 }
 0x108   : > { %v2639_v8 = vpop.f32.mrb[0].mxu0 }
 0x109   : > { %v513_v10 = vmul.f32 %v2639_v8, %v511_v6  ;;  %v2643_v11 = vpop.f32.mrb[1].mxu0  ;;  %v523_v21 = vmul.f32 %v2639_v8, %v521_v17 }
 0x10a   : > { %v512_v12 = vmul.f32 %v511_v6, %v2643_v11  ;;  %v522_v23 = vmul.f32 %v521_v17, %v2643_v11 }
 0x10b   : > { %v2646_v13 = vadd.f32 %v513_v10, %v427_v7  ;;  %v525_v30 = vadd.f32 %v523_v21, %v519_v20  ;;  %v1076_v20 = vld [vmem:[%s2967_s5 + $0x70] sm:$0xff]  ;;  %v1077_v21 = vld [vmem:[%s2967_s5 + $0x78] sm:$0xff] }
 0x10c   : > { %v2648_v14 = vadd.f32 %v512_v12, %v426_v9  ;;  %v524_v32 = vadd.f32 %v522_v23, %v518_v22  ;;  %v711_v22 = vstv %s1967_s21  ;;  %v715_v23 = vstv %s1968_s22  ;;  %s2817_s22 = sand.u32 1, %s2483_s10   ;;  %s2019_s21 = sshll.u32 %s2569_s13, 8 }
 0x10d   : > { %v529_v25 = vmul.f32 %v527_v18, %v2646_v13  ;;  %v616_v62 = vmul.f32 %v614_v56, %v2646_v13  ;;  %s2853_s26 = scalar_lea.hbm %s2970_s8, %s2019_s21  ;;  %s1759_s28 = scalar_lea.sflag [#allocation3], %s2817_s22 }
 0x10e   : > { %v2229_v15 = vpack.c.bf16 %v2646_v13, %v2648_v14  ;;  %v528_v28 = vmul.f32 %v527_v18, %v2648_v14  ;;  %v615_v5 = vmul.f32 %v614_v56, %v2648_v14  ;;  %v1162_v56 = vld [vmem:[%s2733_s29 + $0x8] sm:$0xff] }
 0x110   : > { %2230 = vmatprep.subr.bf16.mxu0 %v2229_v15 }
 0x111   : > { %2232 = vmatpush3.bf16.msra.mxu0 %v2229_v15 }
 0x114   : > { %2107 = vmatmul.mubr.msk.f32.vlgmr.msra.gmra.mrb[2].mxu0 %vm429_vm0, %v2633_v4 }
 0x115   : > { %2113 = vmatprep.mubr.msk.f32.mxu0 %vm429_vm0, %v422_v3 }
 0x1e7   : > { %v2108_v24 = vpop.f32.mrb[2].mxu0 }
 0x1e8   : > { %v608_v26 = vmul.f32 %v2108_v24, %v606_v19  ;;  %v597_v27 = vpop.f32.mrb[3].mxu0  ;;  %v620_v59 = vmul.f32 %v2108_v24, %v618_v55  ;;  %v721_v24 = vstv %s1969_s23  ;;  %s1941_s23 = sshll.u32 %s2817_s22, 4 }
 0x1e9   : > { %v607_v29 = vmul.f32 %v606_v19, %v597_v27  ;;  %v619_v60 = vmul.f32 %v618_v55, %v597_v27  ;;  %v717_v27 = vmul.f32 %v2639_v8, %v715_v23  ;;  %v1161_v8 = vld [vmem:[%s2733_s29] sm:$0xff] }
 0x1ea   : > { %v610_v31 = vadd.f32 %v608_v26, %v529_v25  ;;  %v622_v9 = vadd.f32 %v620_v59, %v616_v62  ;;  %v800_v25 = vstv %s1970_s24  ;;  %v713_v26 = vmul.f32 %v711_v22, %v2624_v1  ;;  %s2822_s24 = scalar_lea.vmem [#allocation5], %s1941_s23 }
 0x1eb   : > { %v609_v33 = vadd.f32 %v607_v29, %v528_v28  ;;  %v621_v12 = vadd.f32 %v619_v60, %v615_v5  ;;  %v712_v28 = vmul.f32 %v711_v22, %v2622_v0  ;;  %v716_v29 = vmul.f32 %v715_v23, %v2643_v11  ;;  %v1975_v11 = vld [vmem:[%s2969_s7] ss:$0 sm:$0xff]  ;;  %v1313_v23 = vld [vmem:[%s2968_s6 + $0x10] sm:$0xff]  ;;  %s1777_s23 = sshll.u32 %s2822_s24, 4  ;;  %s2855_s23 = int_to_ptr.vmem [resolvable:$true] %s1777_s23 }
 0x1ec   : > { %v612_v34 = vadd.f32 %v610_v31, %v525_v30  ;;  %v719_v36 = vadd.f32 %v717_v27, %v713_v26  ;;  %v1311_v60 = vld [vmem:[%s2968_s6] sm:$0xff]  ;;  %p2400_p13 = scmp.lt.s32.totalorder %s2855_s23, %s2398_s16 }
 0x1ed   : > { %v611_v37 = vadd.f32 %v609_v33, %v524_v32 }
 0x1ee   : > { %v626_v63 = vmul.f32 %v624_v57, %v612_v34 }
 0x1ef   : > { %v2233_v38 = vpack.c.bf16 %v612_v34, %v611_v37  ;;  %v625_v6 = vmul.f32 %v624_v57, %v611_v37  ;;  %v1163_v57 = vld [vmem:[%s2733_s29 + $0x10] sm:$0xff] }
 0x1f1   : > { %2234 = vmatprep.subr.bf16.mxu0 %v2233_v38 }
 0x1f2   : > { %2236 = vmatpush3.bf16.msra.mxu0 %v2233_v38  ;;  %v718_v38 = vadd.f32 %v716_v29, %v712_v28 }
 0x1f3   : > { %2242 = vmatprep.subr.bf16.mxu0 %v2241_v39 }
 0x1f5   : > { %2114 = vmatmul.mubr.msk.f32.vlgmr.msra.gmra.mrb[4].mxu0 %vm429_vm0, %v2633_v4 }
 0x1f6   : > { %2244 = vmatpush3.bf16.msra.mxu0 %v2241_v39  ;;  %2131 = vmatprep.mubr.msk.f32.mxu0 %vm812_vm1, %v2648_v14  ;;  %v1075_v14 = vld [vmem:[%s2967_s5 + $0x68] sm:$0xff] }
 0x1f7   : > { %2246 = vmatprep.subr.bf16.mxu0 %v2245_v42 }
 0x1fa   : > { %2248 = vmatpush3.bf16.msra.mxu0 %v2245_v42 }
 0x1fb   : > { %2250 = vmatprep.subr.bf16.mxu0 %v2249_v45 }
 0x1fd   : > { %2132 = vmatmul.mubr.msk.f32.vlgmr.msra.gmra.mrb[6].mxu0 %vm812_vm1, %v2646_v13  ;;  %v1074_v13 = vld [vmem:[%s2967_s5 + $0x60] sm:$0xff] }
 0x1fe   : > { %2252 = vmatpush3.bf16.msra.mxu0 %v2249_v45  ;;  %2142 = vmatprep.mubr.msk.f32.mxu0 %vm812_vm1, %v611_v37  ;;  %v2265_v19 = vpack.c.bf16 %v1075_v14, %v1074_v13  ;;  %v1315_v45 = vld [vmem:[%s2968_s6 + $0x20] sm:$0xff]  ;;  %v1168_v13 = vld [vmem:[%s2733_s29 + $0x38] sm:$0xff] }
 0x1ff   : > { %2254 = vmatprep.subr.bf16.mxu0 %v2253_v48 }
 0x202   : > { %2256 = vmatpush3.bf16.msra.mxu0 %v2253_v48 }
 0x203   : > { %2258 = vmatprep.subr.bf16.mxu0 %v2257_v51 }
 0x205   : > { %2143 = vmatmul.mubr.msk.f32.vlgmr.msra.gmra.mrb[6].mxu0 %vm812_vm1, %v612_v34 }
 0x206   : > { %2260 = vmatpush3.bf16.msra.mxu0 %v2257_v51  ;;  %v2277_v51 = vpack.c.bf16 %v1316_v46, %v1315_v45  ;;  %v2004_v45 = vld [vmem:[%s2969_s7 + $0x2] ss:$0 sm:$0xff] }
 0x207   : > { %2262 = vmatprep.subr.bf16.mxu0 %v2261_v54 }
 0x20a   : > { %2264 = vmatpush3.bf16.msra.mxu0 %v2261_v54  ;;  %v1318_v54 = vld [vmem:[%s2968_s6 + $0x38] sm:$0xff] }
 0x20b   : > { %2266 = vmatprep.subr.bf16.mxu0 %v2265_v19 }
 0x2c8   : > { %v2115_v61 = vpop.f32.mrb[4].mxu0 }
 0x2c9   : > { %v705_v2 = vmul.f32 %v2115_v61, %v703_v58  ;;  %v694_v3 = vpop.f32.mrb[5].mxu0  ;;  %v1312_v61 = vld [vmem:[%s2968_s6 + $0x8] sm:$0xff] }
 0x2ca   : > { %v704_v7 = vmul.f32 %v703_v58, %v694_v3  ;;  %v2281_v58 = vpack.c.bf16 %v1318_v54, %v1317_v53  ;;  %v2285_v3 = vpack.c.bf16 %v1312_v61, %v1311_v60 }
 0x2cb   : > { %v707_v10 = vadd.f32 %v705_v2, %v626_v63  ;;  %v1164_v63 = vld [vmem:[%s2733_s29 + $0x18] sm:$0xff]  ;;  %v1165_v2 = vld [vmem:[%s2733_s29 + $0x20] sm:$0xff] }
 0x2cc   : > { %v706_v15 = vadd.f32 %v704_v7, %v625_v6  ;;  %v2770_v6 = vld [vmem:[%s415_s27] sm:$0xff] }
 0x2cd   : > { %v709_v16 = vadd.f32 %v707_v10, %v622_v9  ;;  %v1166_v9 = vld [vmem:[%s2733_s29 + $0x28] sm:$0xff]  ;;  %v1167_v10 = vld [vmem:[%s2733_s29 + $0x30] sm:$0xff]  ;;  %vm1298_vm2 = vcmp.ge.f32.partialorder %v2770_v6, 0.0  ;;  %s2393_s29 = scalar_lea.vmem %s2855_s23, 256 }
 0x2ce   : > { %v708_v17 = vadd.f32 %v706_v15, %v621_v12  ;;  %v1302_v12 = vmul.f32 0.2, %v2770_v6  ;;  %v2777_v15 = vld [vmem:[%s415_s27 + $0x8] sm:$0xff]  ;;  %p2394_p9 = scmp.ne.s32.totalorder %s2855_s23, %s2393_s29 }
 0x2cf   : > { %v723_v31 = vmul.f32 %v721_v24, %v709_v16  ;;  %v1303_v14 = vmul.f32 0.2, %v2777_v15  ;;  %vm1299_vm3 = vcmp.ge.f32.partialorder %v2777_v15, 0.0 }
 0x2d0   : > { %2153 = vmatprep.mubr.msk.f32.mxu0 %vm812_vm1, %v708_v17  ;;  %v2237_v18 = vpack.c.bf16 %v709_v16, %v708_v17  ;;  %v722_v34 = vmul.f32 %v721_v24, %v708_v17  ;;  %v2780_v17 = vld [vmem:[%s415_s27 + $0x10] sm:$0xff]  ;;  %v1314_v24 = vld [vmem:[%s2968_s6 + $0x18] sm:$0xff]  ;;  %p2395_p10 = pnand %p2394_p9, %p2586_p5 }
 0x2d1   : > { %2154 = vmatmul.mubr.msk.f32.vlgmr.msra.gmra.mrb[6].mxu0 %vm812_vm1, %v709_v16  ;;  %vm1300_vm4 = vcmp.ge.f32.partialorder %v2780_v17, 0.0  ;;  %v1307_v27 = vsel %vm1299_vm3, %v2777_v15, %v1303_v14 }
 0x2d2   : > { %2238 = vmatprep.subr.bf16.mxu1 %v2237_v18  ;;  %2268 = vmatpush3.bf16.msra.mxu0 %v2265_v19  ;;  %v1306_v19 = vsel %vm1298_vm2, %v2770_v6, %v1302_v12  ;;  %p2396_p12 = pneg %p2395_p10 }
 0x2d3   : > { %2240 = vmatpush3.bf16.msra.mxu1 %v2237_v18 }
 0x2d6   : > { %2121 = vmatmul.mubr.msk.f32.vlgmr.msra.gmra.mrb[0].mxu1 %vm429_vm0, %v2633_v4  ;;  %v2269_v4 = vpack.c.bf16 %v1077_v21, %v1076_v20  ;;  %v1304_v20 = vmul.f32 0.2, %v2780_v17  ;;  %v2789_v21 = vld [vmem:[%s415_s27 + $0x18] sm:$0xff] }
 0x2d7   : > { %2171 = vmatprep.mubr.msk.f32.mxu1 %vm429_vm0, %v1161_v8  ;;  %v1305_v28 = vmul.f32 0.2, %v2789_v21  ;;  %vm1301_vm5 = vcmp.ge.f32.partialorder %v2789_v21, 0.0 }
 0x2d8   : > { %2270 = vmatprep.subr.bf16.mxu0 %v2269_v4  ;;  %v1308_v29 = vsel %vm1300_vm4, %v2780_v17, %v1304_v20 }
 0x2d9   : > { %2272 = vmatpush3.bf16.msra.mxu0 %v2269_v4 }
 0x3a9   : > { %v2122_v30 = vpop.f32.mrb[0].mxu1 }
 0x3aa   : > { %v802_v32 = vmul.f32 %v2122_v30, %v800_v25  ;;  %v791_v33 = vpop.f32.mrb[1].mxu1  ;;  %v2289_v30 = vpack.c.bf16 %v1314_v24, %v1313_v23 }
 0x3ab   : > { %v801_v35 = vmul.f32 %v800_v25, %v791_v33 }
 0x3ac   : > { %v804_v37 = vadd.f32 %v802_v32, %v723_v31 }
 0x3ad   : > { %v803_v39 = vadd.f32 %v801_v35, %v722_v34  ;;  %v1309_v34 = vsel %vm1301_vm5, %v2789_v21, %v1305_v28 }
 0x3ae   : > { %v806_v40 = vadd.f32 %v804_v37, %v719_v36 }
 0x3af   : > { %v805_v41 = vadd.f32 %v803_v39, %v718_v38 }
 0x3b1   : > { %2164 = vmatprep.mubr.msk.f32.mxu0 %vm812_vm1, %v805_v41 }
 0x3b2   : > { %2165 = vmatmul.mubr.msk.f32.vlgmr.msra.gmra.mrb[6].mxu0 %vm812_vm1, %v806_v40 }
 0x485   : > { %v2166_v42 = vpop.f32.mrb[6].mxu0 }
 0x486   : > { %v2301_v43 = vadd.f32 %v2166_v42, %v1975_v11  ;;  %v1150_v44 = vpop.f32.mrb[7].mxu0  ;;  %v2003_v42 = vld [vmem:[%s2969_s7 + $0x1] ss:$0 sm:$0xff] }
 0x487   : > { %v2302_v47 = vadd.f32 %v1975_v11, %v1150_v44 }
 0x488   : > { %v1631_v48 = vsel %vm812_vm1, %v2301_v43, 0.0 }
 0x489   : > { %v1630_v49 = vsel %vm812_vm1, %v2302_v47, 0.0  ;;  %v2273_v50 = vpack.c.bf16 %v2301_v43, %v2302_v47 }
 0x48a   : > { %v1632_v52 = vadd.f32 %v1631_v48, %v1630_v49 }
 0x48b   : > { %2274 = vmatprep.subr.bf16.mxu1 %v2273_v50 }
 0x48c   : > { %v1633_v55 = vrot.slane %v1632_v52, 4  ;;  %2276 = vmatpush3.bf16.msra.mxu1 %v2273_v50 }
 0x48d   : > { %2278 = vmatprep.subr.bf16.mxu1 %v2277_v51 }
 0x48e   : > { %v1634_v59 = vadd.f32 %v1633_v55, %v1632_v52 }
 0x48f   : > { %2172 = vmatmul.mubr.msk.f32.vlgmr.msra.gmra.mrb[2].mxu1 %vm429_vm0, %v1162_v56  ;;  %v1513_v56 = vld [vmem:[%s2968_s6 + $0x40] sm:$0xff] }
 0x490   : > { %v1635_v62 = vrot.slane %v1634_v59, 2  ;;  %2174 = vmatprep.mubr.msk.f32.mxu1 %vm429_vm0, %v1163_v57  ;;  %2280 = vmatpush3.bf16.msra.mxu1 %v2277_v51  ;;  %v1514_v57 = vld [vmem:[%s2968_s6 + $0x48] sm:$0xff] }
 0x491   : > { %2282 = vmatprep.subr.bf16.mxu1 %v2281_v58 }
 0x492   : > { %v1636_v5 = vadd.f32 %v1635_v62, %v1634_v59 }
 0x493   : > { %2175 = vmatmul.mubr.msk.f32.gmra.mrb[4].mxu1 %vm429_vm0, %v1164_v63 }
 0x494   : > { %v1637_v7 = vrot.slane %v1636_v5, 1  ;;  %2177 = vmatprep.mubr.msk.f32.mxu1 %vm429_vm0, %v1165_v2  ;;  %2284 = vmatpush3.bf16.msra.mxu1 %v2281_v58  ;;  %v2293_v58 = vpack.c.bf16 %v1514_v57, %v1513_v56 }
 0x495   : > { %2286 = vmatprep.subr.bf16.mxu1 %v2285_v3 }
 0x496   : > { %v1638_v16 = vadd.f32 %v1637_v7, %v1636_v5 }
 0x497   : > { %2178 = vmatmul.mubr.msk.f32.gmra.mrb[6].mxu1 %vm429_vm0, %v1166_v9 }
 0x498   : > { %v1639_v18 = vmul.f32 0.0625, %v1638_v16  ;;  %2180 = vmatprep.mubr.msk.f32.mxu1 %vm429_vm0, %v1167_v10 }
 0x49a   : > { %v1640_v4 = vsub.f32 %v2302_v47, %v1639_v18  ;;  %v1641_v22 = vsub.f32 %v2301_v43, %v1639_v18 }
 0x49b   : > { %2181 = vmatmul.mubr.msk.f32.gmra.mrb[8].mxu1 %vm429_vm0, %v1168_v13 }
 0x49c   : > { %v1642_v25 = vmul.f32 %v1640_v4, %v1640_v4  ;;  %v1643_v26 = vmul.f32 %v1641_v22, %v1641_v22  ;;  %2191 = vmatprep.mubr.msk.f32.mxu1 %vm812_vm1, %v1306_v19 }
 0x49e   : > { %v1644_v31 = vsel %vm812_vm1, %v1642_v25, 0.0  ;;  %v1645_v32 = vsel %vm812_vm1, %v1643_v26, 0.0 }
 0x49f   : > { %v1646_v33 = vadd.f32 %v1645_v32, %v1644_v31  ;;  %2192 = vmatmul.mubr.msk.f32.vlgmr.msra.gmra.mrb[10].mxu1 %vm812_vm1, %v1307_v27 }
 0x4a0   : > { %2288 = vmatpush3.bf16.msra.mxu1 %v2285_v3  ;;  %2194 = vmatprep.mubr.msk.f32.mxu1 %vm812_vm1, %v1308_v29 }
 0x4a1   : > { %v1647_v35 = vrot.slane %v1646_v33, 4  ;;  %2290 = vmatprep.subr.bf16.mxu1 %v2289_v30 }
 0x4a3   : > { %v1648_v36 = vadd.f32 %v1647_v35, %v1646_v33  ;;  %2195 = vmatmul.mubr.msk.f32.gmra.mrb[12].mxu1 %vm812_vm1, %v1309_v34 }
 0x4a4   : > { %2292 = vmatpush3.bf16.msra.mxu1 %v2289_v30 }
 0x4a5   : > { %v1649_v37 = vrot.slane %v1648_v36, 2  ;;  %2294 = vmatprep.subr.bf16.mxu1 %v2293_v58 }
 0x4a7   : > { %v1650_v38 = vadd.f32 %v1649_v37, %v1648_v36 }
 0x4a9   : > { %v1651_v39 = vrot.slane %v1650_v38, 1 }
 0x4ab   : > { %v1652_v40 = vadd.f32 %v1651_v39, %v1650_v38 }
 0x4ad   : > { %v1653_v41 = vmul.f32 0.0625, %v1652_v40 }
 0x4af   : > { %v1654_v8 = vadd.f32 1e-05, %v1653_v41 }
 0x4b1   : > { %2374 = vrsqrt.f32 %v1654_v8 }
 0x4bb   : > { %v2375_v11 = vpop.eup %2374 }
 0x4bc   : > { %v1656_v43 = vmul.f32 %v2375_v11, %v1640_v4  ;;  %v1657_v44 = vmul.f32 %v2375_v11, %v1641_v22 }
 0x4be   : > { %v1662_v46 = vmul.f32 %v2003_v42, %v1656_v43  ;;  %v1663_v47 = vmul.f32 %v2003_v42, %v1657_v44 }
 0x4c0   : > { %v1668_v48 = vadd.f32 %v2004_v45, %v1662_v46  ;;  %v1669_v49 = vadd.f32 %v2004_v45, %v1663_v47 }
 0x4c2   : > { %vm1670_vm6 = vcmp.ge.f32.partialorder %v1668_v48, 0.0  ;;  %vm1671_vm7 = vcmp.ge.f32.partialorder %v1669_v49, 0.0  ;;  %v1672_v50 = vmul.f32 0.2, %v1668_v48  ;;  %v1673_v51 = vmul.f32 0.2, %v1669_v49 }
 0x4c4   : > { %v1674_v52 = vsel %vm1670_vm6, %v1668_v48, %v1672_v50  ;;  %v1675_v53 = vsel %vm1671_vm7, %v1669_v49, %v1673_v51 }
 0x4c5   : > { %v1676_v54 = vadd.f32 %v1674_v52, %v2622_v0  ;;  %v1677_v55 = vadd.f32 %v1675_v53, %v2624_v1  ;;  %v1515_v0 = vld [vmem:[%s2968_s6 + $0x50] sm:$0xff]  ;;  %v1516_v1 = vld [vmem:[%s2968_s6 + $0x58] sm:$0xff] }
 0x4c6   : > { %v2297_v61 = vpack.c.bf16 %v1516_v1, %v1515_v0 }
 0x4c7   : > { %1678 = vst.msk [vmem:[%s2822_s24] sm:$0xff] %vm812_vm1, %v1676_v54  ;;  %1679 = vst.msk [vmem:[%s2822_s24 + $0x8] sm:$0xff] %vm812_vm1, %v1677_v55  ;;  %s2399_s24 = scalar_lea.vmem %s2398_s16, 512 }
 0x4c8   : > { %p2401_p0 = scmp.lt.s32.totalorder %s2399_s24, %s2393_s29 }
 0x4ca   : > { %p2402_p1 = por %p2401_p0, %p2400_p13 }
 0x4cc   : > { %p2403_p2 = pnand %p2402_p1, %p2396_p12 }
 0x562   : > { %v2173_v59 = vpop.f32.mrb[2].mxu1 }
 0x563   : > { %v1259_v60 = vpop.f32.mrb[3].mxu1 }
 0x564   : > { %2205 = vmatprep.mubr.msk.f32.mxu1 %vm812_vm1, %v1259_v60 }
 0x565   : > { %2206 = vmatmul.mubr.msk.f32.vlgmr.msra.gmra.mrb[10].mxu1 %vm812_vm1, %v2173_v59 }
 0x566   : > { %v2176_v62 = vpop.f32.mrb[4].mxu1  ;;  %2296 = vmatpush3.bf16.msra.mxu1 %v2293_v58 }
 0x567   : > { %v1269_v63 = vpop.f32.mrb[5].mxu1  ;;  %2298 = vmatprep.subr.bf16.mxu1 %v2297_v61 }
 0x568   : > { %2208 = vmatprep.mubr.msk.f32.mxu1 %vm812_vm1, %v1269_v63 }
 0x569   : > { %2209 = vmatmul.mubr.msk.f32.gmra.mrb[12].mxu1 %vm812_vm1, %v2176_v62 }
 0x56a   : > { %v2179_v2 = vpop.f32.mrb[6].mxu1  ;;  %2300 = vmatpush3.bf16.msra.mxu1 %v2297_v61 }
 0x56b   : > { %v1279_v3 = vpop.f32.mrb[7].mxu1 }
 0x56c   : > { %2219 = vmatprep.mubr.msk.f32.mxu1 %vm812_vm1, %v1279_v3 }
 0x56d   : > { %2220 = vmatmul.mubr.msk.f32.vlgmr.msra.gmra.mrb[10].mxu1 %vm812_vm1, %v2179_v2 }
 0x56e   : > { %v2182_v5 = vpop.f32.mrb[8].mxu1 }
 0x56f   : > { %v1289_v7 = vpop.f32.mrb[9].mxu1 }
 0x570   : > { %2222 = vmatprep.mubr.msk.f32.mxu1 %vm812_vm1, %v1289_v7 }
 0x571   : > { %2223 = vmatmul.mubr.msk.f32.gmra.mrb[12].mxu1 %vm812_vm1, %v2182_v5 }
 0x572   : > { %2406 = shalt.err (!%p2403_p2)
}
 0x573   : > { %s2407_s17 = scalar_lea.hbm %s2853_s26, 256  ;;  %s2411_s25 = scalar_lea.hbm %s2970_s8, 1024 }
 0x574   : > { %p2408_p3 = scmp.ne.s32.totalorder %s2853_s26, %s2407_s17  ;;  %p2412_p8 = scmp.lt.u32.totalorder %s2853_s26, %s2970_s8 }
 0x575   : > { %p2413_p11 = scmp.lt.u32.totalorder %s2411_s25, %s2407_s17  ;;  %p2415_p10 = scmp.lt.u32.totalorder %s2407_s17, %s2853_s26 }
 0x576   : > { %p2409_p4 = pnand %p2408_p3, %p2586_p5 }
 0x577   : > { %p2414_p9 = por %p2413_p11, %p2412_p8 }
 0x578   : > { %p2410_p7 = pneg %p2409_p4 }
 0x579   : > { %p2416_p12 = por %p2415_p10, %p2414_p9 }
 0x57b   : > { %p2417_p13 = pnand %p2416_p12, %p2410_p7 }
 0x57d   : > { %2420 = shalt.err (!%p2417_p13)
}
 0x57e   : > { %s2495_s29 = smov 128   ;;  %s2496_s24 = smov 8   ;;  %v2002_v9 = vld [vmem:[%s2969_s7 + $0x3] ss:$0 sm:$0xff]  ;;  %v2005_v57 = vld [vmem:[%s2969_s7 + $0x4] ss:$0 sm:$0xff] }
 0x57f   : > { %2321 = dma.vmem_to_hbm [thread:$0]  (%p2586_p5), %s2855_s23, 256, %s2853_s26, %s1759_s28, %s2495_s29, %s2495_s29, %s2496_s24  }
 0x580   : > { %v2006_v60 = vld [vmem:[%s2969_s7 + $0x5] ss:$0 sm:$0xff]  ;;  %s1942_s25 = sshll.u32 %s2817_s22, 5  ;;  %s2020_s14 = sshll.u32 %s2569_s13, 9 }
 0x581   : > { %s395_s16 = scalar_lea.vmem [#allocation6], %s1942_s25  ;;  %s2910_s13 = scalar_lea.hbm %s2971_s9, %s2020_s14 }
 0x582   : > { %s1793_s21 = sshll.u32 %s395_s16, 4  ;;  %s2497_s17 = smov [#allocation6]   ;;  %s2912_s21 = int_to_ptr.vmem [resolvable:$true] %s1793_s21 }
 0x583   : > { %s2421_s28 = scalar_lea.vmem %s2912_s21, 512  ;;  %s2425_s25 = sshll.u32 %s2497_s17, 4  ;;  %s2426_s25 = int_to_ptr.vmem [resolvable:$false] %s2425_s25 }
 0x584   : > { %p2422_p0 = scmp.ne.s32.totalorder %s2912_s21, %s2421_s28  ;;  %s2427_s14 = scalar_lea.vmem %s2426_s25, 1024 }
 0x585   : > { %p2428_p3 = scmp.lt.s32.totalorder %s2912_s21, %s2426_s25  ;;  %p2429_p4 = scmp.lt.s32.totalorder %s2427_s14, %s2421_s28 }
 0x586   : > { %p2423_p1 = pnand %p2422_p0, %p2586_p5 }
 0x587   : > { %p2430_p7 = por %p2429_p4, %p2428_p3 }
 0x588   : > { %p2424_p2 = pneg %p2423_p1 }
 0x58a   : > { %p2431_p8 = pnand %p2430_p7, %p2424_p2 }
 0x640   : > { %v2221_v10 = vpop.f32.mrb[10].mxu1 }
 0x641   : > { %v1623_v12 = vadd.f32 %v2221_v10, %v2002_v9  ;;  %v1595_v16 = vpop.f32.mrb[11].mxu1 }
 0x642   : > { %v1622_v18 = vadd.f32 %v2002_v9, %v1595_v16 }
 0x643   : > { %v1681_v13 = vsel %vm812_vm1, %v1623_v12, 0.0 }
 0x644   : > { %v1680_v14 = vsel %vm812_vm1, %v1622_v18, 0.0  ;;  %v2224_v19 = vpop.f32.mrb[12].mxu1 }
 0x645   : > { %v1682_v20 = vadd.f32 %v1681_v13, %v1680_v14  ;;  %v1605_v4 = vpop.f32.mrb[13].mxu1  ;;  %v1625_v22 = vadd.f32 %v2224_v19, %v2002_v9 }
 0x646   : > { %v1624_v23 = vadd.f32 %v2002_v9, %v1605_v4 }
 0x647   : > { %v1685_v26 = vsel %vm812_vm1, %v1625_v22, 0.0 }
 0x648   : > { %v1683_v24 = vsel %vm812_vm1, %v1624_v23, 0.0 }
 0x649   : > { %v1684_v25 = vadd.f32 %v1683_v24, %v1682_v20 }
 0x64b   : > { %v1686_v27 = vadd.f32 %v1685_v26, %v1684_v25 }
 0x64d   : > { %v1687_v28 = vrot.slane %v1686_v27, 4 }
 0x64f   : > { %v1688_v29 = vadd.f32 %v1687_v28, %v1686_v27 }
 0x651   : > { %v1689_v30 = vrot.slane %v1688_v29, 2 }
 0x653   : > { %v1690_v31 = vadd.f32 %v1689_v30, %v1688_v29 }
 0x655   : > { %v1691_v32 = vrot.slane %v1690_v31, 1 }
 0x657   : > { %v1692_v33 = vadd.f32 %v1691_v32, %v1690_v31 }
 0x659   : > { %v1693_v34 = vmul.f32 0.03125, %v1692_v33 }
 0x65b   : > { %v1694_v35 = vsub.f32 %v1622_v18, %v1693_v34  ;;  %v1695_v36 = vsub.f32 %v1623_v12, %v1693_v34  ;;  %v1696_v37 = vsub.f32 %v1624_v23, %v1693_v34  ;;  %v1697_v38 = vsub.f32 %v1625_v22, %v1693_v34 }
 0x65d   : > { %v1698_v39 = vmul.f32 %v1694_v35, %v1694_v35  ;;  %v1699_v40 = vmul.f32 %v1695_v36, %v1695_v36  ;;  %v1700_v41 = vmul.f32 %v1696_v37, %v1696_v37  ;;  %v1701_v8 = vmul.f32 %v1697_v38, %v1697_v38 }
 0x65f   : > { %v1702_v11 = vsel %vm812_vm1, %v1698_v39, 0.0  ;;  %v1703_v42 = vsel %vm812_vm1, %v1699_v40, 0.0  ;;  %v1705_v44 = vsel %vm812_vm1, %v1700_v41, 0.0  ;;  %v1707_v46 = vsel %vm812_vm1, %v1701_v8, 0.0 }
 0x660   : > { %v1704_v43 = vadd.f32 %v1703_v42, %v1702_v11 }
 0x662   : > { %v1706_v45 = vadd.f32 %v1705_v44, %v1704_v43 }
 0x664   : > { %v1708_v47 = vadd.f32 %v1707_v46, %v1706_v45 }
 0x666   : > { %v1709_v48 = vrot.slane %v1708_v47, 4 }
 0x668   : > { %v1710_v49 = vadd.f32 %v1709_v48, %v1708_v47 }
 0x66a   : > { %v1711_v50 = vrot.slane %v1710_v49, 2 }
 0x66c   : > { %v1712_v51 = vadd.f32 %v1711_v50, %v1710_v49 }
 0x66e   : > { %v1713_v52 = vrot.slane %v1712_v51, 1 }
 0x670   : > { %v1714_v53 = vadd.f32 %v1713_v52, %v1712_v51 }
 0x672   : > { %v1715_v54 = vmul.f32 0.03125, %v1714_v53 }
 0x674   : > { %v1716_v55 = vadd.f32 1e-05, %v1715_v54 }
 0x676   : > { %2376 = vrsqrt.f32 %v1716_v55 }
 0x680   : > { %v2377_v56 = vpop.eup %2376 }
 0x681   : > { %v1718_v58 = vmul.f32 %v2377_v56, %v1694_v35  ;;  %v1719_v0 = vmul.f32 %v2377_v56, %v1695_v36  ;;  %v1720_v1 = vmul.f32 %v2377_v56, %v1696_v37  ;;  %v1721_v59 = vmul.f32 %v2377_v56, %v1697_v38 }
 0x683   : > { %v1726_v61 = vmul.f32 %v2005_v57, %v1718_v58  ;;  %v1727_v62 = vmul.f32 %v2005_v57, %v1719_v0  ;;  %v1728_v63 = vmul.f32 %v2005_v57, %v1720_v1  ;;  %v1729_v2 = vmul.f32 %v2005_v57, %v1721_v59 }
 0x685   : > { %v1734_v3 = vadd.f32 %v2006_v60, %v1726_v61  ;;  %v1735_v5 = vadd.f32 %v2006_v60, %v1727_v62  ;;  %v1736_v7 = vadd.f32 %v2006_v60, %v1728_v63  ;;  %v1737_v9 = vadd.f32 %v2006_v60, %v1729_v2 }
 0x687   : > { %vm1738_vm8 = vcmp.ge.f32.partialorder %v1734_v3, 0.0  ;;  %vm1739_vm9 = vcmp.ge.f32.partialorder %v1735_v5, 0.0  ;;  %vm1740_vm10 = vcmp.ge.f32.partialorder %v1736_v7, 0.0  ;;  %vm1741_vm11 = vcmp.ge.f32.partialorder %v1737_v9, 0.0 }
 0x688   : > { %v1742_v10 = vmul.f32 0.2, %v1734_v3  ;;  %v1743_v12 = vmul.f32 0.2, %v1735_v5  ;;  %v1744_v16 = vmul.f32 0.2, %v1736_v7 }
 0x689   : > { %v1745_v18 = vmul.f32 0.2, %v1737_v9 }
 0x68a   : > { %v1746_v13 = vsel %vm1738_vm8, %v1734_v3, %v1742_v10  ;;  %v1747_v14 = vsel %vm1739_vm9, %v1735_v5, %v1743_v12  ;;  %v1748_v19 = vsel %vm1740_vm10, %v1736_v7, %v1744_v16 }
 0x68b   : > { %v1749_v20 = vsel %vm1741_vm11, %v1737_v9, %v1745_v18  ;;  %v1750_v4 = vadd.f32 %v1746_v13, %v2770_v6  ;;  %v1751_v22 = vadd.f32 %v1747_v14, %v2777_v15  ;;  %v1752_v23 = vadd.f32 %v1748_v19, %v2780_v17 }
 0x68c   : > { %v1753_v24 = vadd.f32 %v1749_v20, %v2789_v21 }
 0x68d   : > { %1754 = vst.msk [vmem:[%s395_s16] sm:$0xff] %vm812_vm1, %v1750_v4  ;;  %1755 = vst.msk [vmem:[%s395_s16 + $0x8] sm:$0xff] %vm812_vm1, %v1751_v22 }
 0x68e   : > { %1756 = vst.msk [vmem:[%s395_s16 + $0x10] sm:$0xff] %vm812_vm1, %v1752_v23  ;;  %1757 = vst.msk [vmem:[%s395_s16 + $0x18] sm:$0xff] %vm812_vm1, %v1753_v24 }
 0x68f   : > { %2434 = shalt.err (!%p2431_p8)
}
 0x690   : > { %s2435_s16 = scalar_lea.hbm %s2910_s13, 512  ;;  %s2439_s17 = scalar_lea.hbm %s2971_s9, 2048 }
 0x691   : > { %p2436_p11 = scmp.ne.s32.totalorder %s2910_s13, %s2435_s16  ;;  %p2440_p12 = scmp.lt.u32.totalorder %s2910_s13, %s2971_s9 }
 0x692   : > { %p2441_p13 = scmp.lt.u32.totalorder %s2439_s17, %s2435_s16  ;;  %p2443_p1 = scmp.lt.u32.totalorder %s2435_s16, %s2910_s13 }
 0x693   : > { %p2437_p9 = pnand %p2436_p11, %p2586_p5 }
 0x694   : > { %p2442_p0 = por %p2441_p13, %p2440_p12 }
 0x695   : > { %p2438_p10 = pneg %p2437_p9 }
 0x696   : > { %p2444_p2 = por %p2443_p1, %p2442_p0 }
 0x698   : > { %p2445_p3 = pnand %p2444_p2, %p2438_p10 }
 0x69a   : > { %2448 = shalt.err (!%p2445_p3)
}
 0x69b   : > { %s2975_s28 = scalar_lea.sflag [#allocation7], %s2817_s22 }
 0x69c   : > { %2322 = dma.vmem_to_hbm [thread:$0]  (%p2586_p5), %s2912_s21, 512, %s2910_s13, %s2975_s28, %s2495_s29, %s2495_s29, %s2496_s24  }
 0x69d PF: > { %p2338_p4 = scmp.ge.s32.totalorder %s2491_s12, 2  ;;  %s1808_s26 = sand.u32 1, %s2479_s30  }
 0x69e   : > { %s1809_s14 = scalar_lea.sflag [#allocation3], %s1808_s26 }
 0x69f   : > { %p2330_p7 = pnand %p2338_p4, %p2590_p6 }
 0x6a1   : > { %2470 = dma.done.wait (!%p2330_p7), %s1809_s14, 256  }
 0x6a2   : > { %2472 = vsyncadd (!%p2330_p7), %s1809_s14, 4294967040  ;;  %s1818_s19 = scalar_lea.sflag [#allocation7], %s1808_s26 }
 0x6a3   : > { %2474 = dma.done.wait (!%p2330_p7), %s1818_s19, 512  }
 0x6a4   : > { %2476 = vsyncadd (!%p2330_p7), %s1818_s19, 4294966784  ;;  %p24_p5 = scmp.ge.s32.totalorder %s2573_s15, 6   ;;  %s2976_s30 = smov %s2483_s10 }
 0x6a5   : > { %s2977_s10 = smov %s2487_s11  ;;  %s2978_s11 = smov %s2584_s18 }
 0x6a6   : > { %s2979_s12 = smov %s2573_s15  ;;  %26 = sbr.rel (!%p24_p5) target bundleno = 6 (0x6), region = 118 }
 0x6ad   :  { %1823 = vsyncpa [#allocation3], 1 }
 0x6ae   :  { %1825 = vsyncpa [#allocation3 + $0x1], 1 }
 0x6af   :  { %1826 = vsyncpa [#allocation7], 1 }
 0x6b0   :  { %1828 = vsyncpa [#allocation7 + $0x1], 1 }
 0x6b1   :  { %1829 = vsyncpa [#allocation4], 1 }
 0x6b2   :  { %1831 = vsyncpa [#allocation4 + $0x1], 1 }

</bundles_post_ra>
